<compile_context>
chip_gen: v6e
topology: v6e:2x2x1
jax: 0.10.0
libtpu: 0.0.40
codegen_flags: <defaults>
</compile_context>

<pallas_src>
import functools
import math

import jax
import jax.numpy as jnp
import numpy as np
from jax.experimental import pallas as pl
from jax.experimental.pallas import tpu as pltpu


def _layer_norm(x, gamma, beta, eps):
    mean = jnp.mean(x, axis=-1, keepdims=True)
    var = jnp.mean(jnp.square(x - mean), axis=-1, keepdims=True)
    return (x - mean) * jax.lax.rsqrt(var + eps) * gamma + beta


def gpt_decoder_layer_kernel(
    x_ref, mask_ref,
    wqkv_ref, bqkv_ref,
    wo_ref, bo_ref,
    g1_ref, be1_ref,
    w1_ref, bb1_ref, w2_ref, bb2_ref,
    g3_ref, be3_ref,
    out_ref,
    *, n_heads, kdim, vdim, eps, compute_dtype):
    x = x_ref[...]                                   # (S, D) f32 — one batch element
    S, D = x.shape
    scale = jnp.float32(1.0 / math.sqrt(kdim))
    hk = n_heads * kdim

    def mm(a, w_ref, b_ref):
        return (jnp.dot(a.astype(compute_dtype), w_ref[...],
                        preferred_element_type=jnp.float32) + b_ref[...])

    # ---- fused QKV projection: one lane-dense matmul (S, D) x (D, H*(2k+v)) ----
    qkv = mm(x, wqkv_ref, bqkv_ref)                  # (S, H*(2*kdim+vdim)) f32
    q = qkv[:, :hk].reshape(S, n_heads, kdim)
    k = qkv[:, hk:2 * hk].reshape(S, n_heads, kdim)
    v = qkv[:, 2 * hk:].reshape(S, n_heads, vdim)

    # ---- attention, heads batched (no Python head loop, no explicit transposes) ----
    prod = jnp.einsum('shc,thc->hst',
                      q.astype(compute_dtype), k.astype(compute_dtype),
                      preferred_element_type=jnp.float32)          # (H, S, S)
    # PyTorch order: masked_fill(mask==0, -inf) then divide by sqrt(kdim).
    # Large finite negative avoids NaNs for any fully-masked row.
    prod = jnp.where(mask_ref[...][None, :, :] == 0, jnp.float32(-1e30), prod) * scale
    m = jnp.max(prod, axis=-1, keepdims=True)
    e = jnp.exp(prod - m)
    denom = jnp.sum(e, axis=-1, keepdims=True)
    alpha = e * pl.reciprocal(denom, approx=True)                  # softmax(-1)
    attn = jnp.einsum('hst,thv->shv',
                      alpha.astype(compute_dtype), v.astype(compute_dtype),
                      preferred_element_type=jnp.float32)          # (S, H, vdim)
    concat = attn.reshape(S, n_heads * vdim)                       # == torch.cat order

    mha = jnp.maximum(mm(concat, wo_ref, bo_ref), 0.0)             # wo + ReLU

    # TODO(synk): nn.Dropout is identity here (eval mode); no train-time RNG.
    y = _layer_norm(x + mha, g1_ref[...], be1_ref[...], eps)       # layer_norm1

    # ---- FFN ----
    h1 = jnp.maximum(mm(y, w1_ref, bb1_ref), 0.0)
    f = mm(h1, w2_ref, bb2_ref)
    z = _layer_norm(y + f, g3_ref[...], be3_ref[...], eps)         # layer_norm3

    out_ref[...] = z.astype(out_ref.dtype)


def gpt_decoder_layer(src, memory, mask, params, *, n_heads, kdim, vdim,
                      eps=1e-5, compute_dtype=jnp.float32):
    del memory  # unused by the PyTorch forward
    S, B, D = src.shape

    # Fuse + pre-transpose all weights OUTSIDE the kernel (one-time XLA ops) so
    # the kernel never does `.T` and the QKV projection is a single matmul.
    def stack(w):        # (H, out, D) -> (D, H*out), column block h == head h
        return jnp.transpose(w, (2, 0, 1)).reshape(D, -1)

    wqkv = jnp.concatenate([stack(params["wq"]), stack(params["wk"]),
                            stack(params["wv"])], axis=1).astype(compute_dtype)
    bqkv = jnp.concatenate([params["bq"].reshape(1, -1),
                            params["bk"].reshape(1, -1),
                            params["bv"].reshape(1, -1)], axis=1)
    wo_t = params["wo"].T.astype(compute_dtype)      # (H*vdim, D)
    w1_t = params["w1"].T.astype(compute_dtype)      # (D, DFF)
    w2_t = params["w2"].T.astype(compute_dtype)      # (DFF, D)

    x_b = jnp.transpose(src, (1, 0, 2))              # (B, S, D): batch is the grid axis

    args = (x_b, mask, wqkv, bqkv, wo_t, params["bo"],
            params["g1"], params["be1"],
            w1_t, params["bb1"], w2_t, params["bb2"],
            params["g3"], params["be3"])

    def rep(a):          # whole array resident in VMEM, same block every grid step
        nd = a.ndim
        return pl.BlockSpec(a.shape, lambda b, _nd=nd: (0,) * _nd)

    in_specs = ([pl.BlockSpec((None, S, D), lambda b: (b, 0, 0))]
                + [rep(a) for a in args[1:]])
    out_specs = pl.BlockSpec((None, S, D), lambda b: (b, 0, 0))

    kernel = functools.partial(gpt_decoder_layer_kernel, n_heads=n_heads,
                               kdim=kdim, vdim=vdim, eps=eps,
                               compute_dtype=compute_dtype)
    out_bsd = pl.pallas_call(
        kernel,
        out_shape=jax.ShapeDtypeStruct((B, S, D), jnp.float32),
        grid_spec=pltpu.PrefetchScalarGridSpec(
            num_scalar_prefetch=0, grid=(B,),
            in_specs=in_specs, out_specs=out_specs),
        compiler_params=pltpu.CompilerParams(
            dimension_semantics=("parallel",),       # shard batch over TCs (v7x)
            vmem_limit_bytes=32 * 1024 * 1024),
    )(*args)
    return jnp.transpose(out_bsd, (1, 0, 2))         # back to (S, B, D)


def reference(src, mask, params, *, n_heads, kdim, vdim, eps=1e-5):
    """Pure-JAX per-head mirror of the PyTorch forward (validates the fusion)."""
    S, B, D = src.shape
    x2 = src.reshape(S * B, D)
    outs = []
    for h in range(n_heads):
        q = (x2 @ params["wq"][h].T + params["bq"][h]).reshape(S, B, kdim)
        k = (x2 @ params["wk"][h].T + params["bk"][h]).reshape(S, B, kdim)
        v = (x2 @ params["wv"][h].T + params["bv"][h]).reshape(S, B, vdim)
        qb, kb, vb = (jnp.transpose(t, (1, 0, 2)) for t in (q, k, v))
        prod = jnp.einsum('bsk,btk->bst', qb, kb)
        prod = jnp.where(mask[None] == 0, -jnp.inf, prod) / math.sqrt(kdim)
        alpha = jax.nn.softmax(prod, axis=-1)
        outs.append(jnp.transpose(jnp.einsum('bst,btv->bsv', alpha, vb), (1, 0, 2)))
    concat = jnp.concatenate(outs, axis=-1).reshape(S * B, n_heads * vdim)
    mha = jnp.maximum(concat @ params["wo"].T + params["bo"], 0.0)
    y = _layer_norm(x2 + mha, params["g1"], params["be1"], eps)
    h1 = jnp.maximum(y @ params["w1"].T + params["bb1"], 0.0)
    f = h1 @ params["w2"].T + params["bb2"]
    z = _layer_norm(y + f, params["g3"], params["be3"], eps)
    return z.reshape(S, B, D)


def init_params(key, d_model, dff, n_heads, kdim, vdim):
    ks = jax.random.split(key, 12)
    s = 0.1
    f32 = jnp.float32
    return {
        "wq": jax.random.normal(ks[0], (n_heads, kdim, d_model), f32) * s,
        "bq": jax.random.normal(ks[1], (n_heads, kdim), f32) * s,
        "wk": jax.random.normal(ks[2], (n_heads, kdim, d_model), f32) * s,
        "bk": jax.random.normal(ks[3], (n_heads, kdim), f32) * s,
        "wv": jax.random.normal(ks[4], (n_heads, vdim, d_model), f32) * s,
        "bv": jax.random.normal(ks[5], (n_heads, vdim), f32) * s,
        "wo": jax.random.normal(ks[6], (d_model, n_heads * vdim), f32) * s,
        "bo": jax.random.normal(ks[7], (1, d_model), f32) * s,
        "g1": jnp.ones((1, d_model), f32) + 0.05 * jax.random.normal(ks[8], (1, d_model), f32),
        "be1": 0.05 * jax.random.normal(ks[9], (1, d_model), f32),
        "w1": jax.random.normal(ks[10], (dff, d_model), f32) * s,
        "bb1": jnp.zeros((1, dff), f32),
        "w2": jax.random.normal(ks[11], (d_model, dff), f32) * s,
        "bb2": jnp.zeros((1, d_model), f32),
        "g3": jnp.ones((1, d_model), f32),
        "be3": jnp.zeros((1, d_model), f32),
    }


if __name__ == "__main__":
    # Small, decoder-consistent shapes: seq=8, batch=2, d_model=32, dff=64,
    # n_heads=4 (kdim = d_model // n_heads = 8), vdim=8.
    S, B, D = 8, 2, 32
    DFF, H, VD = 64, 4, 8
    KD = D // H

    key = jax.random.PRNGKey(0)
    k_src, k_mem, k_par = jax.random.split(key, 3)
    src = jax.random.normal(k_src, (S, B, D), jnp.float32)
    memory = jax.random.normal(k_mem, (S, B, D), jnp.float32)   # unused by forward
    mask = jnp.tril(jnp.ones((S, S), jnp.float32))              # causal mask
    params = init_params(k_par, D, DFF, H, KD, VD)

    out = gpt_decoder_layer(src, memory, mask, params,
                            n_heads=H, kdim=KD, vdim=VD, eps=1e-5,
                            compute_dtype=jnp.float32)
    out = jax.block_until_ready(out)

    ref = jax.block_until_ready(
        reference(src, mask, params, n_heads=H, kdim=KD, vdim=VD, eps=1e-5))
    # Tolerance covers pl.reciprocal(approx=True) in the softmax denominator.
    np.testing.assert_allclose(np.asarray(out), np.asarray(ref),
                               rtol=2e-3, atol=2e-3)
    print("KERNEL_OK")
</pallas_src>

<mosaic_0001>
module attributes {stable_mosaic.version = 11 : i64} {
  func.func @gpt_decoder_layer_kernel(%arg0: i32, %arg1: memref<1x8x32xf32, #tpu.memory_space<vmem>>, %arg2: memref<8x8xf32, #tpu.memory_space<vmem>>, %arg3: memref<32x96xf32, #tpu.memory_space<vmem>>, %arg4: memref<1x96xf32, #tpu.memory_space<vmem>>, %arg5: memref<32x32xf32, #tpu.memory_space<vmem>>, %arg6: memref<1x32xf32, #tpu.memory_space<vmem>>, %arg7: memref<1x32xf32, #tpu.memory_space<vmem>>, %arg8: memref<1x32xf32, #tpu.memory_space<vmem>>, %arg9: memref<32x64xf32, #tpu.memory_space<vmem>>, %arg10: memref<1x64xf32, #tpu.memory_space<vmem>>, %arg11: memref<64x32xf32, #tpu.memory_space<vmem>>, %arg12: memref<1x32xf32, #tpu.memory_space<vmem>>, %arg13: memref<1x32xf32, #tpu.memory_space<vmem>>, %arg14: memref<1x32xf32, #tpu.memory_space<vmem>>, %arg15: memref<1x8x32xf32, #tpu.memory_space<vmem>>) attributes {dimension_semantics = [#tpu.dimension_semantics<parallel>], iteration_bounds = array<i64: 2>, scalar_prefetch = 0 : i64, scratch_operands = 0 : i64, tpu.core_type = #tpu.core_type<tc>, window_params = [{transform_indices = @transform_0, window_bounds = array<i64: 1, 8, 32>}, {pipeline_mode = #tpu.pipeline_mode<synchronous>, transform_indices = @transform_1, window_bounds = array<i64: 8, 8>}, {pipeline_mode = #tpu.pipeline_mode<synchronous>, transform_indices = @transform_2, window_bounds = array<i64: 32, 96>}, {pipeline_mode = #tpu.pipeline_mode<synchronous>, transform_indices = @transform_3, window_bounds = array<i64: 1, 96>}, {pipeline_mode = #tpu.pipeline_mode<synchronous>, transform_indices = @transform_4, window_bounds = array<i64: 32, 32>}, {pipeline_mode = #tpu.pipeline_mode<synchronous>, transform_indices = @transform_5, window_bounds = array<i64: 1, 32>}, {pipeline_mode = #tpu.pipeline_mode<synchronous>, transform_indices = @transform_6, window_bounds = array<i64: 1, 32>}, {pipeline_mode = #tpu.pipeline_mode<synchronous>, transform_indices = @transform_7, window_bounds = array<i64: 1, 32>}, {pipeline_mode = #tpu.pipeline_mode<synchronous>, transform_indices = @transform_8, window_bounds = array<i64: 32, 64>}, {pipeline_mode = #tpu.pipeline_mode<synchronous>, transform_indices = @transform_9, window_bounds = array<i64: 1, 64>}, {pipeline_mode = #tpu.pipeline_mode<synchronous>, transform_indices = @transform_10, window_bounds = array<i64: 64, 32>}, {pipeline_mode = #tpu.pipeline_mode<synchronous>, transform_indices = @transform_11, window_bounds = array<i64: 1, 32>}, {pipeline_mode = #tpu.pipeline_mode<synchronous>, transform_indices = @transform_12, window_bounds = array<i64: 1, 32>}, {pipeline_mode = #tpu.pipeline_mode<synchronous>, transform_indices = @transform_13, window_bounds = array<i64: 1, 32>}, {transform_indices = @transform_14, window_bounds = array<i64: 1, 8, 32>}]} {
    %c0 = arith.constant 0 : index
    %c0_0 = arith.constant 0 : index
    %c0_1 = arith.constant 0 : index
    %0 = vector.load %arg1[%c0, %c0_0, %c0_1] : memref<1x8x32xf32, #tpu.memory_space<vmem>>, vector<1x8x32xf32>
    %1 = vector.shape_cast %0 : vector<1x8x32xf32> to vector<8x32xf32>
    %c0_2 = arith.constant 0 : index
    %c0_3 = arith.constant 0 : index
    %2 = vector.load %arg3[%c0_2, %c0_3] : memref<32x96xf32, #tpu.memory_space<vmem>>, vector<32x96xf32>
    %cst = arith.constant dense<0.000000e+00> : vector<8x96xf32>
    %3 = tpu.matmul %1, %2, %cst {dimension_numbers = #tpu.dot_dimension_numbers<[1], [0], [0], [1], [0, 0, 1, 1], [], []>} : vector<8x32xf32>, vector<32x96xf32>, vector<8x96xf32> -> vector<8x96xf32>
    %c0_4 = arith.constant 0 : index
    %c0_5 = arith.constant 0 : index
    %4 = vector.load %arg4[%c0_4, %c0_5] : memref<1x96xf32, #tpu.memory_space<vmem>>, vector<1x96xf32>
    %5 = vector.broadcast %4 : vector<1x96xf32> to vector<8x96xf32>
    %6 = arith.addf %3, %5 : vector<8x96xf32>
    %7 = vector.extract_strided_slice %6 {offsets = [0, 0], sizes = [8, 32], strides = [1, 1]} : vector<8x96xf32> to vector<8x32xf32>
    %8 = vector.shape_cast %7 : vector<8x32xf32> to vector<8x4x8xf32>
    %9 = vector.extract_strided_slice %6 {offsets = [0, 32], sizes = [8, 32], strides = [1, 1]} : vector<8x96xf32> to vector<8x32xf32>
    %10 = vector.shape_cast %9 : vector<8x32xf32> to vector<8x4x8xf32>
    %11 = vector.extract_strided_slice %6 {offsets = [0, 64], sizes = [8, 32], strides = [1, 1]} : vector<8x96xf32> to vector<8x32xf32>
    %12 = vector.shape_cast %11 : vector<8x32xf32> to vector<8x4x8xf32>
    "tpu.trace_start"() <{level = 10 : i32, message = "shc,thc->hst"}> : () -> ()
    %cst_6 = arith.constant dense<0.000000e+00> : vector<4x8x8xf32>
    %13 = tpu.matmul %8, %10, %cst_6 {dimension_numbers = #tpu.dot_dimension_numbers<[2], [2], [0], [0], [0, 1, 0, 0, 1, 0], [1], [1]>} : vector<8x4x8xf32>, vector<8x4x8xf32>, vector<4x8x8xf32> -> vector<4x8x8xf32>
    "tpu.trace_stop"() : () -> ()
    %c0_7 = arith.constant 0 : index
    %c0_8 = arith.constant 0 : index
    %14 = vector.load %arg2[%c0_7, %c0_8] : memref<8x8xf32, #tpu.memory_space<vmem>>, vector<8x8xf32>
    %15 = vector.shape_cast %14 : vector<8x8xf32> to vector<1x8x8xf32>
    %cst_9 = arith.constant 0.000000e+00 : f32
    %16 = vector.broadcast %cst_9 : f32 to vector<1x8x8xf32>
    %17 = arith.cmpf oeq, %15, %16 : vector<1x8x8xf32>
    %cst_10 = arith.constant -1.000000e+30 : f32
    %18 = vector.shape_cast %17 : vector<1x8x8xi1> to vector<1x8x8xi1>
    %19 = vector.broadcast %18 : vector<1x8x8xi1> to vector<4x8x8xi1>
    %20 = vector.broadcast %cst_10 : f32 to vector<4x8x8xf32>
    %21 = arith.select %19, %20, %13 : vector<4x8x8xi1>, vector<4x8x8xf32>
    %cst_11 = arith.constant 0.353553385 : f32
    %22 = vector.broadcast %cst_11 : f32 to vector<4x8x8xf32>
    %23 = arith.mulf %21, %22 : vector<4x8x8xf32>
    %cst_12 = arith.constant dense<0xFF800000> : vector<4x8xf32>
    %24 = vector.multi_reduction <maximumf>, %23, %cst_12 [2] : vector<4x8x8xf32> to vector<4x8xf32>
    %25 = vector.shape_cast %24 : vector<4x8xf32> to vector<4x8x1xf32>
    %26 = vector.broadcast %25 : vector<4x8x1xf32> to vector<4x8x8xf32>
    %27 = arith.subf %23, %26 : vector<4x8x8xf32>
    %28 = math.exp %27 : vector<4x8x8xf32>
    %cst_13 = arith.constant dense<0.000000e+00> : vector<4x8xf32>
    %29 = vector.multi_reduction <add>, %28, %cst_13 [2] : vector<4x8x8xf32> to vector<4x8xf32>
    %30 = vector.shape_cast %29 : vector<4x8xf32> to vector<4x8x1xf32>
    %31 = tpu.reciprocal %30 {approx = true} : vector<4x8x1xf32> -> vector<4x8x1xf32>
    %32 = vector.broadcast %31 : vector<4x8x1xf32> to vector<4x8x8xf32>
    %33 = arith.mulf %28, %32 : vector<4x8x8xf32>
    "tpu.trace_start"() <{level = 10 : i32, message = "hst,thv->shv"}> : () -> ()
    %cst_14 = arith.constant dense<0.000000e+00> : vector<4x8x8xf32>
    %34 = tpu.matmul %12, %33, %cst_14 {dimension_numbers = #tpu.dot_dimension_numbers<[0], [2], [2], [1], [0, 1, 0, 2, 1, 1], [1], [0]>} : vector<8x4x8xf32>, vector<4x8x8xf32>, vector<4x8x8xf32> -> vector<4x8x8xf32>
    %35 = tpu.transpose %34, [2, 0, 1] : vector<4x8x8xf32> -> vector<8x4x8xf32>
    "tpu.trace_stop"() : () -> ()
    %36 = vector.shape_cast %35 : vector<8x4x8xf32> to vector<8x32xf32>
    %c0_15 = arith.constant 0 : index
    %c0_16 = arith.constant 0 : index
    %37 = vector.load %arg5[%c0_15, %c0_16] : memref<32x32xf32, #tpu.memory_space<vmem>>, vector<32x32xf32>
    %cst_17 = arith.constant dense<0.000000e+00> : vector<8x32xf32>
    %38 = tpu.matmul %36, %37, %cst_17 {dimension_numbers = #tpu.dot_dimension_numbers<[1], [0], [0], [1], [0, 0, 1, 1], [], []>} : vector<8x32xf32>, vector<32x32xf32>, vector<8x32xf32> -> vector<8x32xf32>
    %c0_18 = arith.constant 0 : index
    %c0_19 = arith.constant 0 : index
    %39 = vector.load %arg6[%c0_18, %c0_19] : memref<1x32xf32, #tpu.memory_space<vmem>>, vector<1x32xf32>
    %40 = vector.broadcast %39 : vector<1x32xf32> to vector<8x32xf32>
    %41 = arith.addf %38, %40 : vector<8x32xf32>
    %cst_20 = arith.constant 0.000000e+00 : f32
    %42 = vector.broadcast %cst_20 : f32 to vector<8x32xf32>
    %43 = arith.maximumf %41, %42 : vector<8x32xf32>
    %44 = arith.addf %1, %43 : vector<8x32xf32>
    %c0_21 = arith.constant 0 : index
    %c0_22 = arith.constant 0 : index
    %45 = vector.load %arg7[%c0_21, %c0_22] : memref<1x32xf32, #tpu.memory_space<vmem>>, vector<1x32xf32>
    %c0_23 = arith.constant 0 : index
    %c0_24 = arith.constant 0 : index
    %46 = vector.load %arg8[%c0_23, %c0_24] : memref<1x32xf32, #tpu.memory_space<vmem>>, vector<1x32xf32>
    %cst_25 = arith.constant dense<0.000000e+00> : vector<8xf32>
    %47 = vector.multi_reduction <add>, %44, %cst_25 [1] : vector<8x32xf32> to vector<8xf32>
    %48 = vector.shape_cast %47 : vector<8xf32> to vector<8x1xf32>
    %cst_26 = arith.constant 3.200000e+01 : f32
    %49 = vector.broadcast %cst_26 : f32 to vector<8x1xf32>
    %50 = arith.divf %48, %49 : vector<8x1xf32>
    %51 = vector.broadcast %50 : vector<8x1xf32> to vector<8x32xf32>
    %52 = arith.subf %44, %51 : vector<8x32xf32>
    %53 = arith.mulf %52, %52 : vector<8x32xf32>
    %cst_27 = arith.constant dense<0.000000e+00> : vector<8xf32>
    %54 = vector.multi_reduction <add>, %53, %cst_27 [1] : vector<8x32xf32> to vector<8xf32>
    %55 = vector.shape_cast %54 : vector<8xf32> to vector<8x1xf32>
    %cst_28 = arith.constant 3.200000e+01 : f32
    %56 = vector.broadcast %cst_28 : f32 to vector<8x1xf32>
    %57 = arith.divf %55, %56 : vector<8x1xf32>
    %58 = vector.broadcast %50 : vector<8x1xf32> to vector<8x32xf32>
    %59 = arith.subf %44, %58 : vector<8x32xf32>
    %cst_29 = arith.constant 9.99999974E-6 : f32
    %60 = vector.broadcast %cst_29 : f32 to vector<8x1xf32>
    %61 = arith.addf %57, %60 : vector<8x1xf32>
    %62 = math.rsqrt %61 : vector<8x1xf32>
    %63 = vector.broadcast %62 : vector<8x1xf32> to vector<8x32xf32>
    %64 = arith.mulf %59, %63 : vector<8x32xf32>
    %65 = vector.broadcast %45 : vector<1x32xf32> to vector<8x32xf32>
    %66 = arith.mulf %64, %65 : vector<8x32xf32>
    %67 = vector.broadcast %46 : vector<1x32xf32> to vector<8x32xf32>
    %68 = arith.addf %66, %67 : vector<8x32xf32>
    %c0_30 = arith.constant 0 : index
    %c0_31 = arith.constant 0 : index
    %69 = vector.load %arg9[%c0_30, %c0_31] : memref<32x64xf32, #tpu.memory_space<vmem>>, vector<32x64xf32>
    %cst_32 = arith.constant dense<0.000000e+00> : vector<8x64xf32>
    %70 = tpu.matmul %68, %69, %cst_32 {dimension_numbers = #tpu.dot_dimension_numbers<[1], [0], [0], [1], [0, 0, 1, 1], [], []>} : vector<8x32xf32>, vector<32x64xf32>, vector<8x64xf32> -> vector<8x64xf32>
    %c0_33 = arith.constant 0 : index
    %c0_34 = arith.constant 0 : index
    %71 = vector.load %arg10[%c0_33, %c0_34] : memref<1x64xf32, #tpu.memory_space<vmem>>, vector<1x64xf32>
    %72 = vector.broadcast %71 : vector<1x64xf32> to vector<8x64xf32>
    %73 = arith.addf %70, %72 : vector<8x64xf32>
    %cst_35 = arith.constant 0.000000e+00 : f32
    %74 = vector.broadcast %cst_35 : f32 to vector<8x64xf32>
    %75 = arith.maximumf %73, %74 : vector<8x64xf32>
    %c0_36 = arith.constant 0 : index
    %c0_37 = arith.constant 0 : index
    %76 = vector.load %arg11[%c0_36, %c0_37] : memref<64x32xf32, #tpu.memory_space<vmem>>, vector<64x32xf32>
    %cst_38 = arith.constant dense<0.000000e+00> : vector<8x32xf32>
    %77 = tpu.matmul %75, %76, %cst_38 {dimension_numbers = #tpu.dot_dimension_numbers<[1], [0], [0], [1], [0, 0, 1, 1], [], []>} : vector<8x64xf32>, vector<64x32xf32>, vector<8x32xf32> -> vector<8x32xf32>
    %c0_39 = arith.constant 0 : index
    %c0_40 = arith.constant 0 : index
    %78 = vector.load %arg12[%c0_39, %c0_40] : memref<1x32xf32, #tpu.memory_space<vmem>>, vector<1x32xf32>
    %79 = vector.broadcast %78 : vector<1x32xf32> to vector<8x32xf32>
    %80 = arith.addf %77, %79 : vector<8x32xf32>
    %81 = arith.addf %68, %80 : vector<8x32xf32>
    %c0_41 = arith.constant 0 : index
    %c0_42 = arith.constant 0 : index
    %82 = vector.load %arg13[%c0_41, %c0_42] : memref<1x32xf32, #tpu.memory_space<vmem>>, vector<1x32xf32>
    %c0_43 = arith.constant 0 : index
    %c0_44 = arith.constant 0 : index
    %83 = vector.load %arg14[%c0_43, %c0_44] : memref<1x32xf32, #tpu.memory_space<vmem>>, vector<1x32xf32>
    %cst_45 = arith.constant dense<0.000000e+00> : vector<8xf32>
    %84 = vector.multi_reduction <add>, %81, %cst_45 [1] : vector<8x32xf32> to vector<8xf32>
    %85 = vector.shape_cast %84 : vector<8xf32> to vector<8x1xf32>
    %cst_46 = arith.constant 3.200000e+01 : f32
    %86 = vector.broadcast %cst_46 : f32 to vector<8x1xf32>
    %87 = arith.divf %85, %86 : vector<8x1xf32>
    %88 = vector.broadcast %87 : vector<8x1xf32> to vector<8x32xf32>
    %89 = arith.subf %81, %88 : vector<8x32xf32>
    %90 = arith.mulf %89, %89 : vector<8x32xf32>
    %cst_47 = arith.constant dense<0.000000e+00> : vector<8xf32>
    %91 = vector.multi_reduction <add>, %90, %cst_47 [1] : vector<8x32xf32> to vector<8xf32>
    %92 = vector.shape_cast %91 : vector<8xf32> to vector<8x1xf32>
    %cst_48 = arith.constant 3.200000e+01 : f32
    %93 = vector.broadcast %cst_48 : f32 to vector<8x1xf32>
    %94 = arith.divf %92, %93 : vector<8x1xf32>
    %95 = vector.broadcast %87 : vector<8x1xf32> to vector<8x32xf32>
    %96 = arith.subf %81, %95 : vector<8x32xf32>
    %cst_49 = arith.constant 9.99999974E-6 : f32
    %97 = vector.broadcast %cst_49 : f32 to vector<8x1xf32>
    %98 = arith.addf %94, %97 : vector<8x1xf32>
    %99 = math.rsqrt %98 : vector<8x1xf32>
    %100 = vector.broadcast %99 : vector<8x1xf32> to vector<8x32xf32>
    %101 = arith.mulf %96, %100 : vector<8x32xf32>
    %102 = vector.broadcast %82 : vector<1x32xf32> to vector<8x32xf32>
    %103 = arith.mulf %101, %102 : vector<8x32xf32>
    %104 = vector.broadcast %83 : vector<1x32xf32> to vector<8x32xf32>
    %105 = arith.addf %103, %104 : vector<8x32xf32>
    %c0_50 = arith.constant 0 : index
    %c0_51 = arith.constant 0 : index
    %c0_52 = arith.constant 0 : index
    %106 = vector.load %arg15[%c0_50, %c0_51, %c0_52] : memref<1x8x32xf32, #tpu.memory_space<vmem>>, vector<1x8x32xf32>
    %107 = vector.shape_cast %106 : vector<1x8x32xf32> to vector<8x32xf32>
    %108 = vector.shape_cast %105 : vector<8x32xf32> to vector<1x8x32xf32>
    tpu.vector_store %arg15[%c0_50, %c0_51, %c0_52], %108 {strides = array<i32>} : memref<1x8x32xf32, #tpu.memory_space<vmem>>, vector<1x8x32xf32>,
    return
  }
  func.func @transform_0(%arg0: i32) -> (i32, i32, i32) {
    %c0_i32 = arith.constant 0 : i32
    %c0_i32_0 = arith.constant 0 : i32
    %c0_i32_1 = arith.constant 0 : i32
    return %arg0, %c0_i32, %c0_i32_0 : i32, i32, i32
  }
  func.func @transform_1(%arg0: i32) -> (i32, i32) {
    %c0_i32 = arith.constant 0 : i32
    %c0_i32_0 = arith.constant 0 : i32
    %c0_i32_1 = arith.constant 0 : i32
    return %c0_i32, %c0_i32_0 : i32, i32
  }
  func.func @transform_2(%arg0: i32) -> (i32, i32) {
    %c0_i32 = arith.constant 0 : i32
    %c0_i32_0 = arith.constant 0 : i32
    %c0_i32_1 = arith.constant 0 : i32
    return %c0_i32, %c0_i32_0 : i32, i32
  }
  func.func @transform_3(%arg0: i32) -> (i32, i32) {
    %c0_i32 = arith.constant 0 : i32
    %c0_i32_0 = arith.constant 0 : i32
    %c0_i32_1 = arith.constant 0 : i32
    return %c0_i32, %c0_i32_0 : i32, i32
  }
  func.func @transform_4(%arg0: i32) -> (i32, i32) {
    %c0_i32 = arith.constant 0 : i32
    %c0_i32_0 = arith.constant 0 : i32
    %c0_i32_1 = arith.constant 0 : i32
    return %c0_i32, %c0_i32_0 : i32, i32
  }
  func.func @transform_5(%arg0: i32) -> (i32, i32) {
    %c0_i32 = arith.constant 0 : i32
    %c0_i32_0 = arith.constant 0 : i32
    %c0_i32_1 = arith.constant 0 : i32
    return %c0_i32, %c0_i32_0 : i32, i32
  }
  func.func @transform_6(%arg0: i32) -> (i32, i32) {
    %c0_i32 = arith.constant 0 : i32
    %c0_i32_0 = arith.constant 0 : i32
    %c0_i32_1 = arith.constant 0 : i32
    return %c0_i32, %c0_i32_0 : i32, i32
  }
  func.func @transform_7(%arg0: i32) -> (i32, i32) {
    %c0_i32 = arith.constant 0 : i32
    %c0_i32_0 = arith.constant 0 : i32
    %c0_i32_1 = arith.constant 0 : i32
    return %c0_i32, %c0_i32_0 : i32, i32
  }
  func.func @transform_8(%arg0: i32) -> (i32, i32) {
    %c0_i32 = arith.constant 0 : i32
    %c0_i32_0 = arith.constant 0 : i32
    %c0_i32_1 = arith.constant 0 : i32
    return %c0_i32, %c0_i32_0 : i32, i32
  }
  func.func @transform_9(%arg0: i32) -> (i32, i32) {
    %c0_i32 = arith.constant 0 : i32
    %c0_i32_0 = arith.constant 0 : i32
    %c0_i32_1 = arith.constant 0 : i32
    return %c0_i32, %c0_i32_0 : i32, i32
  }
  func.func @transform_10(%arg0: i32) -> (i32, i32) {
    %c0_i32 = arith.constant 0 : i32
    %c0_i32_0 = arith.constant 0 : i32
    %c0_i32_1 = arith.constant 0 : i32
    return %c0_i32, %c0_i32_0 : i32, i32
  }
  func.func @transform_11(%arg0: i32) -> (i32, i32) {
    %c0_i32 = arith.constant 0 : i32
    %c0_i32_0 = arith.constant 0 : i32
    %c0_i32_1 = arith.constant 0 : i32
    return %c0_i32, %c0_i32_0 : i32, i32
  }
  func.func @transform_12(%arg0: i32) -> (i32, i32) {
    %c0_i32 = arith.constant 0 : i32
    %c0_i32_0 = arith.constant 0 : i32
    %c0_i32_1 = arith.constant 0 : i32
    return %c0_i32, %c0_i32_0 : i32, i32
  }
  func.func @transform_13(%arg0: i32) -> (i32, i32) {
    %c0_i32 = arith.constant 0 : i32
    %c0_i32_0 = arith.constant 0 : i32
    %c0_i32_1 = arith.constant 0 : i32
    return %c0_i32, %c0_i32_0 : i32, i32
  }
  func.func @transform_14(%arg0: i32) -> (i32, i32, i32) {
    %c0_i32 = arith.constant 0 : i32
    %c0_i32_0 = arith.constant 0 : i32
    %c0_i32_1 = arith.constant 0 : i32
    return %arg0, %c0_i32, %c0_i32_0 : i32, i32, i32
  }
}

</mosaic_0001>

<bundles_post_ra>
// kernel: tpu_custom_call.1
= control target key start
LH: loop header
LB: loop body
LE: loop exit
PB: predicated region body
PF: predicated region fallthrough
CT: control target
= control target key end

     0   :  { %s3040_s0 = inlined_call_operand.hbm [shape: f32[2,8,32], index: 0, kind: input, shape index: {}]   ;;  %s3041_s1 = inlined_call_operand.hbm [shape: f32[8,8], index: 1, kind: input, shape index: {}]   ;;  %s3042_s2 = inlined_call_operand.vmem [shape: f32[32,96], index: 2, kind: input, shape index: {}]   ;;  %s3043_s3 = inlined_call_operand.vmem [shape: f32[1,96], index: 3, kind: input, shape index: {}]   ;;  %s3044_s4 = inlined_call_operand.vmem [shape: f32[32,32], index: 4, kind: input, shape index: {}]   ;;  %s3045_s5 = inlined_call_operand.vmem [shape: f32[1,32], index: 5, kind: input, shape index: {}]   ;;  %s3046_s6 = inlined_call_operand.vmem [shape: f32[1,32], index: 6, kind: input, shape index: {}]   ;;  %s3047_s7 = inlined_call_operand.vmem [shape: f32[1,32], index: 7, kind: input, shape index: {}]   ;;  %s3048_s8 = inlined_call_operand.vmem [shape: f32[32,64], index: 8, kind: input, shape index: {}]   ;;  %s3049_s9 = inlined_call_operand.vmem [shape: f32[1,64], index: 9, kind: input, shape index: {}]   ;;  %s3050_s10 = inlined_call_operand.vmem [shape: f32[64,32], index: 10, kind: input, shape index: {}]   ;;  %s3051_s11 = inlined_call_operand.vmem [shape: f32[1,32], index: 11, kind: input, shape index: {}]   ;;  %s3052_s12 = inlined_call_operand.vmem [shape: f32[1,32], index: 12, kind: input, shape index: {}]   ;;  %s3053_s13 = inlined_call_operand.vmem [shape: f32[1,32], index: 13, kind: input, shape index: {}]   ;;  %s3054_s14 = inlined_call_operand.hbm [shape: f32[2,8,32], index: 14, kind: output, shape index: {}]  }
   0x1   :  { %3066 = sst [smem:[#allocation17_spill]] %s3041_s1 }
   0x2   :  { %3067 = sst [smem:[#allocation18_spill]] %s3053_s13 }
   0x3   :  { %3068 = sst [smem:[#allocation19_spill]] %s3054_s14 }
   0x4   :  { %19 = vsyncpa [#allocation3], 0 }
   0x5   :  { %21 = vsyncpa [#allocation3 + $0x1], 0 }
   0x6   :  { %22 = vsyncpa [#allocation6], 0 }
   0x7   :  { %23 = vsyncpa [#allocation4], 0 }
   0x8   :  { %25 = vsyncpa [#allocation4 + $0x1], 0  ;;  %s2689_s29 = smov 0   ;;  %s2691_s30 = smov 0  }
   0x9   :  { %s2693_s15 = smov 0   ;;  %s2695_s16 = smov 0  }
   0xa LB: > { %3069 = sst [smem:[#allocation11_spill]] %s2585_s29  ;;  %s2710_s17 = sadd.s32 4294967295, %s2597_s16   ;;  %s2597_s16 = sphi %s2695_s16, %s3096_s16   ;;  %s2593_s15 = sphi %s2693_s15, %s3098_s15   ;;  %s2589_s30 = sphi %s2691_s30, %s3100_s30   ;;  %s2585_s29 = sphi %s2689_s29, %s3099_s29  }
   0xb   : > { %3070 = sst [smem:[#allocation12_spill]] %s2593_s15  ;;  %s2214_s18 = sadd.s32 4294967294, %s2597_s16  }
   0xc   : > { %3071 = sst [smem:[#allocation13_spill]] %s2597_s16  ;;  %p51_p0 = scmp.ne.s32.totalorder %s2589_s30, %s2585_s29 }
   0xd   : > { %p3055_p1 = scmp.eq.s32.totalorder %s2710_s17, 0  ;;  %p354_p3 = scmp.eq.s32.totalorder %s2214_s18, 1 }
   0xe   : > { %p2215_p5 = scmp.ge.s32.totalorder %s2597_s16, 1  ;;  %p361_p7 = scmp.lt.s32.totalorder %s2597_s16, 3 }
   0xf   : > { %p2719_p4 = por %p3055_p1, %p51_p0  ;;  %p2724_p6 = por %p354_p3, %p51_p0 }
  0x10   : > { %p2729_p8 = pnand %p2215_p5, %p361_p7  ;;  %s2599_s22 = smov [#allocation5]  }
  0x11   : > { %s3072_s19 = scalar_select %p2719_p4, 1, 0 }
  0x12   : > { %s3073_s20 = scalar_select %p2724_p6, 1, 0 }
  0x13   : > { %s3075_s21 = scalar_select %p2729_p8, 1, 0 }
  0x14   : > { %3074 = sst [smem:[#allocation14_spill]] %s3073_s20  ;;  %s374_s23 = sshll.u32 %s2599_s22, 4  ;;  %s375_s23 = int_to_ptr.vmem [resolvable:$true] %s374_s23 }
  0x15   : > { %p2394_p10 = pneg %p2729_p8  ;;  %s2737_s24 = sadd.s32 1, %s2597_s16  }
  0x16   : > { %3076 = sst [smem:[#allocation15_spill]] %s2737_s24  ;;  %s35_s26 = ssub.s32 %s2597_s16, %s2737_s24 }
  0x17   : > { %p2741_p11 = pnand %p2394_p10, %p3055_p1  ;;  %p2747_p12 = scmp.eq.s32.totalorder %s35_s26, 0 }
  0x18   : > { %s38_s28 = sadd.s32 1, %s2593_s15  ;;  %p45_p13 = scmp.ne.s32.totalorder %s2593_s15, %s2589_s30 }
  0x19   : > { %p2477_p0 = pneg %p2741_p11  ;;  %s2486_s18 = scalar_lea.vmem %s375_s23, 128 }
  0x1a   : > { %p2487_p3 = scmp.ne.s32.totalorder %s375_s23, %s2486_s18  ;;  %p2494_p9 = scmp.lt.s32.totalorder %s375_s23, %s375_s23 }
  0x1b   : > { %p2495_p2 = scmp.lt.s32.totalorder %s2486_s18, %s2486_s18 }
  0x1c   : > { %p2489_p5 = pnand %p2487_p3, %p2477_p0 }
  0x1d   : > { %p2496_p10 = por %p2495_p2, %p2494_p9 }
  0x1e   : > { %p2490_p7 = pneg %p2489_p5 }
  0x20   : > { %p2497_p1 = pnand %p2496_p10, %p2490_p7 }
  0x22   : > { %2500 = shalt.err (!%p2497_p1)
}
  0x23   : > { %s3079_s1 = sld [smem:[#allocation17_spill]]  ;;  %p46_p1 = scmp.eq.s32.totalorder %s2597_s16, 0 }
  0x24   : > { %s2764_s18 = scalar_select %p2747_p12, %s2593_s15, %s38_s28  }
  0x25   : > { %p3081_p2 = scmp.eq.s32.totalorder %s2710_s17, 1  ;;  %p2407_p0 = scmp.lt.s32.totalorder %s2597_s16, 2 }
  0x26   : > { %3080 = sst [smem:[#allocation16_spill]] %s2764_s18  ;;  %s421_s22 = sand.u32 1, %s2593_s15  }
  0x27   : > { %p2772_p9 = por %p3081_p2, %p45_p13  ;;  %p47_p3 = por %p46_p1, %p45_p13 }
  0x28   : > { %s2218_s26 = sshll.u32 %s421_s22, 3  ;;  %s2219_s24 = sshll.u32 %s2597_s16, 7 }
  0x29   : > { %2397 = dma.hbm_to_vmem [thread:$0]  (!%p2741_p11), %s3079_s1, 128, %s375_s23, [#allocation6]  }
  0x2a   : > { %s3082_s25 = scalar_select %p2772_p9, 1, 0 }
  0x2b   : > { %s2785_s23 = scalar_lea.hbm %s3040_s0, %s2219_s24  ;;  %s425_s27 = scalar_lea.vmem [#allocation2], %s2218_s26 }
  0x2c   : > { %s432_s28 = sshll.u32 %s425_s27, 4  ;;  %p2787_p11 = pnand %p2407_p0, %p47_p3  ;;  %s433_s28 = int_to_ptr.vmem [resolvable:$true] %s432_s28 }
  0x2d   : > { %s422_s18 = scalar_lea.sflag [#allocation3], %s421_s22  ;;  %s2501_s15 = scalar_lea.hbm %s2785_s23, 128 }
  0x2e   : > { %p2502_p12 = scmp.ne.s32.totalorder %s2785_s23, %s2501_s15  ;;  %p2503_p13 = pneg %p2787_p11 }
  0x2f   : > { %s2506_s24 = scalar_lea.hbm %s3040_s0, 256  ;;  %p2507_p10 = scmp.lt.s32.totalorder %s2785_s23, %s3040_s0 }
  0x30   : > { %p2504_p5 = pnand %p2503_p13, %p2502_p12  ;;  %p2508_p1 = scmp.lt.s32.totalorder %s2506_s24, %s2501_s15 }
  0x32   : > { %p2505_p7 = pneg %p2504_p5  ;;  %p2509_p2 = por %p2508_p1, %p2507_p10 }
  0x34   : > { %p2510_p0 = pnand %p2509_p2, %p2505_p7 }
  0x36   : > { %2513 = shalt.err (!%p2510_p0)
}
  0x37   : > { %s2514_s27 = scalar_lea.vmem %s433_s28, 128  ;;  %s2600_s22 = smov [#allocation2]  }
  0x38   : > { %p2515_p3 = scmp.ne.s32.totalorder %s433_s28, %s2514_s27  ;;  %s2519_s14 = sshll.u32 %s2600_s22, 4  ;;  %s2520_s14 = int_to_ptr.vmem [resolvable:$false] %s2519_s14 }
  0x39   : > { %s2521_s13 = scalar_lea.vmem %s2520_s14, 256  ;;  %p2522_p12 = scmp.lt.s32.totalorder %s433_s28, %s2520_s14 }
  0x3a   : > { %p2517_p6 = pnand %p2515_p3, %p2503_p13  ;;  %p2523_p5 = scmp.lt.s32.totalorder %s2521_s13, %s2514_s27 }
  0x3c   : > { %p2518_p9 = pneg %p2517_p6  ;;  %p2524_p4 = por %p2523_p5, %p2522_p12 }
  0x3e   : > { %p2525_p8 = pnand %p2524_p4, %p2518_p9 }
  0x40   : > { %2528 = shalt.err (!%p2525_p8)
}
  0x41   : > { %2401 = dma.hbm_to_vmem [thread:$0]  (!%p2787_p11), %s2785_s23, 128, %s433_s28, %s422_s18  }
  0x42   : > { %p3084_p7 = scmp.ne.s32.totalorder %s3075_s21, 0 }
  0x43   : > { %s2808_s15 = sand.u32 (!%p3084_p7), 1, %s2589_s30   ;;  %p3085_p4 = scmp.ne.s32.totalorder (!%p3084_p7), %s3072_s19, 0 }
  0x44   : > { %441 = sbr.rel (%p3084_p7) target bundleno = 2856 (0xb28), region = 76  ;;  %s2221_s16 = sshll.u32 (!%p3084_p7), %s2808_s15, 3 }
  0x45   : > { %s444_s14 = scalar_lea.sflag (!%p3084_p7), [#allocation3], %s2808_s15  ;;  %s447_s13 = scalar_lea.vmem (!%p3084_p7), [#allocation2], %s2221_s16 }
  0x49   : > { %2572 = dma.done.wait (%p3085_p4), %s444_s14, 128  }
  0x4a   : > { %2574 = vsyncadd (%p3085_p4), %s444_s14, 4294967168  ;;  %p3086_p6 = scmp.eq.s32.totalorder %s2710_s17, 0 }
  0x4c   : > { %2576 = dma.done.wait (%p3086_p6), [#allocation6], 128   ;;  %p3087_p8 = pmov %p3086_p6 }
  0x4d   : > { %v2601_v0 = vmov 0.0   ;;  %vm2602_vm0 = vmmov 0   ;;  %v500_v1 = vld [vmem:[%s3042_s2 + $0x18] sm:$0xff]  ;;  %v499_v2 = vld [vmem:[%s3042_s2 + $0x10] sm:$0xff]  ;;  %v498_v3 = vld [vmem:[%s3042_s2 + $0x8] sm:$0xff]  ;;  %vm508_vm1 = vcmask 261120  }
  0x4e   : > { %2578 = vsyncadd (%p3087_p8), [#allocation6], 4294967168  ;;  %2294 = vmatprep.subr.mxu0 %v2601_v0  ;;  %2302 = vmatprep.mubr.msk.f32.mxu0 %vm2602_vm0, %v2601_v0  ;;  %v497_v4 = vld [vmem:[%s3042_s2] sm:$0xff]  ;;  %s2603_s27 = smov 104   ;;  %s2604_s22 = smov 120   ;;  %vm729_vm2 = vcmask 64512  }
  0x4f   : > { %2305 = vmatprep.subr.mxu1 %v2601_v0  ;;  %2307 = vmatprep.mubr.msk.f32.mxu1 %vm2602_vm0, %v2601_v0  ;;  %v2842_v5 = vld [vmem:[%s447_s13] sm:$0xff]  ;;  %s2605_s14 = smov 96   ;;  %s2606_s13 = smov 112   ;;  %v1018_v21 = vld [vmem:[#allocation5] sm:$0xff]  ;;  %vm1795_vm4 = vcmask 130048   ;;  %vm1797_vm5 = vcmask 195584  }
  0x50   : > { %2295 = vmatpush3.msra.mxu0 %v500_v1  ;;  %v2224_v6 = vld [vmem:[%s3043_s3] ss:$0 sm:$0xff]  ;;  %vm1019_vm3 = vcmp.eq.f32.partialorder %v1018_v21, 0.0  ;;  %s2607_s1 = smov 64   ;;  %s2610_s26 = smov 16   ;;  %vm2015_vm6 = vcmask 523264  }
  0x51   : > { %2296 = vmatprep.subr.mxu0 %v2601_v0  ;;  %s3088_s24 = sld [smem:[#allocation18_spill]]  ;;  %s2121_s21 = scalar_lea.sflag [#allocation4], %s2808_s15 }
  0x52   : > { %2297 = vmatpush3.msra.mxu0 %v499_v2  ;;  %p3090_p11 = scmp.ne.s32.totalorder %s3082_s25, 0  ;;  %s2613_s23 = smov [#allocation7]  }
  0x53   : > { %2298 = vmatprep.subr.mxu0 %v2601_v0 }
  0x54   : > { %2299 = vmatpush3.msra.mxu0 %v498_v3 }
  0x55   : > { %2300 = vmatprep.subr.mxu0 %v2601_v0 }
  0x56   : > { %2301 = vmatpush3.msra.mxu0 %v497_v4 }
  0x57   : > { %2303 = vmatmul.mubr.msk.f32.vlgmr.msra.gmra.mxu0 %vm508_vm1, %v2842_v5  ;;  %2320 = vmatprep.subr.mxu0 %v2601_v0 }
  0x58   : > { %2322 = vmatprep.mubr.msk.f32.mxu0 %vm2602_vm0, %v2601_v0 }
 0x117   : > { %v578_v7 = vpop.f32.mrf.mxu0 }
 0x118   : > { %v2853_v8 = vadd.f32 %v2224_v6, %v578_v7 }
 0x119   : > { %v2304_v9 = vpop.f32.mrf.mxu0 }
 0x11a   : > { %587 = vrot.lane.b32.xlu1 %v2853_v8, %s2603_s27  ;;  %583 = vrot.lane.b32.xlu0 %v2853_v8, %s2604_s22  ;;  %s2611_s27 = smov 8   ;;  %s2612_s22 = smov 24  }
 0x11e   : > { %589 = vrot.lane.b32.xlu1 %v2853_v8, %s2605_s14  ;;  %585 = vrot.lane.b32.xlu0 %v2853_v8, %s2606_s13 }
 0x18c   : > { %v584_v10 = vpop.permute.xlu0 %583  ;;  %v588_v11 = vpop.permute.xlu1 %587 }
 0x18d   : > { %591 = vrot.lane.b32.xlu0 %v584_v10, %s2605_s14 }
 0x190   : > { %v586_v12 = vpop.permute.xlu0 %585  ;;  %v590_v13 = vpop.permute.xlu1 %589 }
 0x191   : > { %595 = vrot.lane.b32.xlu0 %v588_v11, %s2605_s14  ;;  %593 = vrot.lane.b32.xlu1 %v586_v12, %s2605_s14 }
 0x1ba   : > { %601 = vxpose.xlu1.b32.start.end [1/1] (short) (narrow) %v590_v13, 8 }
 0x1ff   : > { %v592_v14 = vpop.permute.xlu0 %591 }
 0x200   : > { %633 = vxpose.xlu0.b32.start.end [1/1] (short) (narrow) %v592_v14, 8 }
 0x203   : > { %v594_v15 = vpop.permute.xlu1 %593  ;;  %v596_v16 = vpop.permute.xlu0 %595 }
 0x204   : > { %665 = vxpose.xlu0.b32.start.end [1/1] (short) (narrow) %v594_v15, 8 }
 0x208   : > { %697 = vxpose.xlu0.b32.start.end [1/1] (short) (narrow) %v596_v16, 8 }
 0x236   : > { %v617_v17 = vpop.trf.xlu1 }
 0x237   : > { %2306 = vmatpush3.msra.mxu1 %v617_v17 }
 0x238   : > { %2308 = vmatmul.mubr.msk.f32.vlgmr.msra.gmra.mxu1 %vm729_vm2, %v2853_v8  ;;  %2310 = vmatprep.subr.mxu1 %v2601_v0 }
 0x239   : > { %2312 = vmatprep.mubr.msk.f32.mxu1 %vm2602_vm0, %v2601_v0 }
 0x27c   : > { %v649_v18 = vpop.trf.xlu0 }
 0x27d   : > { %2311 = vmatpush3.msra.mxu1 %v649_v18 }
 0x27e   : > { %2313 = vmatmul.mubr.msk.f32.vlgmr.msra.gmra.mxu1 %vm729_vm2, %v584_v10  ;;  %2315 = vmatprep.subr.mxu1 %v2601_v0 }
 0x27f   : > { %2317 = vmatprep.mubr.msk.f32.mxu1 %vm2602_vm0, %v2601_v0 }
 0x280   : > { %v681_v19 = vpop.trf.xlu0 }
 0x281   : > { %2316 = vmatpush3.msra.mxu1 %v681_v19 }
 0x282   : > { %2318 = vmatmul.mubr.msk.f32.vlgmr.msra.gmra.mxu1 %vm729_vm2, %v586_v12  ;;  %2325 = vmatprep.subr.mxu1 %v2601_v0 }
 0x283   : > { %2327 = vmatprep.mubr.msk.f32.mxu1 %vm2602_vm0, %v2601_v0 }
 0x284   : > { %v713_v20 = vpop.trf.xlu0 }
 0x285   : > { %2321 = vmatpush3.msra.mxu0 %v713_v20 }
 0x286   : > { %2323 = vmatmul.mubr.msk.f32.vlgmr.msra.gmra.mxu0 %vm729_vm2, %v588_v11  ;;  %2330 = vmatprep.subr.mxu0 %v2601_v0 }
 0x287   : > { %2332 = vmatprep.mubr.msk.f32.mxu0 %vm2602_vm0, %v2601_v0 }
 0x2f8   : > { %v798_v22 = vpop.f32.mrf.mxu1 }
 0x2f9   : > { %v1022_v23 = vsel %vm1019_vm3, -1e+30, %v798_v22 }
 0x2fa   : > { %v1026_v24 = vmul.f32 0.35355338, %v1022_v23  ;;  %v2309_v25 = vpop.f32.mrf.mxu1 }
 0x2fc   : > { %v1030_v26 = vsel %vm729_vm2, %v1026_v24, -inf }
 0x2fd   : > { %1031 = vmax.xlane.f32.xlu1 %v1030_v26 }
 0x33e   : > { %v870_v27 = vpop.f32.mrf.mxu1 }
 0x33f   : > { %v1023_v28 = vsel %vm1019_vm3, -1e+30, %v870_v27 }
 0x340   : > { %v1027_v29 = vmul.f32 0.35355338, %v1023_v28  ;;  %v2314_v30 = vpop.f32.mrf.mxu1  ;;  %v1802_v28 = vld [vmem:[%s3044_s4 + $0x18] sm:$0xff] }
 0x342   : > { %v942_v31 = vpop.f32.mrf.mxu1  ;;  %v1033_v32 = vsel %vm729_vm2, %v1027_v29, -inf }
 0x343   : > { %v1024_v33 = vsel %vm1019_vm3, -1e+30, %v942_v31  ;;  %1034 = vmax.xlane.f32.xlu0 %v1033_v32  ;;  %v1651_v31 = vlaneseq }
 0x344   : > { %v1028_v34 = vmul.f32 0.35355338, %v1024_v33  ;;  %v2319_v35 = vpop.f32.mrf.mxu1 }
 0x346   : > { %v1014_v36 = vpop.f32.mrf.mxu0  ;;  %v1036_v37 = vsel %vm729_vm2, %v1028_v34, -inf }
 0x347   : > { %v1025_v38 = vsel %vm1019_vm3, -1e+30, %v1014_v36  ;;  %1037 = vmax.xlane.f32.xlu1 %v1036_v37  ;;  %v1652_v37 = vshrl.u32 %v1651_v31, 7 }
 0x348   : > { %v1029_v39 = vmul.f32 0.35355338, %v1025_v38  ;;  %v2324_v40 = vpop.f32.mrf.mxu0 }
 0x34a   : > { %v1039_v41 = vsel %vm729_vm2, %v1029_v39, -inf }
 0x34b   : > { %1040 = vmax.xlane.f32.xlu1 %v1039_v41 }
 0x359   : > { %1074 = vrot.lane.b32.xlu0 %v2853_v8, %s2607_s1 }
 0x35c   : > { %1076 = vrot.lane.b32.xlu1 %v584_v10, %s2607_s1 }
 0x35d   : > { %1078 = vrot.lane.b32.xlu0 %v586_v12, %s2607_s1 }
 0x360   : > { %1080 = vrot.lane.b32.xlu1 %v588_v11, %s2607_s1  ;;  %s3089_s1 = sld [smem:[#allocation19_spill]] }
 0x386   : > { %v1032_v42 = vpop.xlane.xlu1 %1031 }
 0x387   : > { %v1042_v43 = vsub.f32 %v1026_v24, %v1032_v42 }
 0x389   : > { %v1046_v44 = vmul.f32 1.442695, %v1042_v43 }
 0x38b   : > { %2455 = vpow2.f32 %v1046_v44 }
 0x398   : > { %v2456_v45 = vpop.eup %2455 }
 0x399   : > { %v1054_v46 = vsel %vm729_vm2, %v2456_v45, 0.0 }
 0x39a   : > { %1055 = vadd.xlane.f32.xlu1 %v1054_v46 }
 0x3cc   : > { %v1035_v47 = vpop.xlane.xlu0 %1034 }
 0x3cd   : > { %v1043_v48 = vsub.f32 %v1027_v29, %v1035_v47  ;;  %v2608_v29 = vmov 1983009808  }
 0x3ce   : > { %v1649_v30 = vunpack.c.l.s4 %v2608_v29 }
 0x3cf   : > { %v1048_v49 = vmul.f32 1.442695, %v1043_v48 }
 0x3d0   : > { %v1038_v50 = vpop.xlane.xlu1 %1037  ;;  %v1075_v62 = vpop.permute.xlu0 %1074  ;;  %v1650_v36 = vunpack.c.0.s8 %v1649_v30 }
 0x3d1   : > { %2457 = vpow2.f32 %v1048_v49  ;;  %v1044_v51 = vsub.f32 %v1028_v34, %v1038_v50  ;;  %v2609_v34 = vmov 1934713408  }
 0x3d2   : > { %v1681_v35 = vunpack.c.l.s4 %v2609_v34  ;;  %v1653_v40 = vsub.s32 %v1650_v36, %v1652_v37 }
 0x3d3   : > { %v1050_v52 = vmul.f32 1.442695, %v1044_v51 }
 0x3d4   : > { %v1041_v53 = vpop.xlane.xlu1 %1040  ;;  %v1079_v1 = vpop.permute.xlu0 %1078 }
 0x3d5   : > { %2459 = vpow2.f32 %v1050_v52  ;;  %v1045_v54 = vsub.f32 %v1029_v39, %v1041_v53  ;;  %v1682_v39 = vunpack.c.0.s8 %v1681_v35 }
 0x3d7   : > { %v1052_v55 = vmul.f32 1.442695, %v1045_v54  ;;  %v1685_v46 = vsub.s32 %v1682_v39, %v1652_v37  ;;  %v1917_v39 = vld [vmem:[%s3048_s8 + $0x10] sm:$0xff] }
 0x3d8   : > { %v1077_v63 = vpop.permute.xlu1 %1076 }
 0x3d9   : > { %2461 = vpow2.f32 %v1052_v55  ;;  %v1801_v55 = vld [vmem:[%s3044_s4 + $0x10] sm:$0xff] }
 0x3dc   : > { %v1081_v2 = vpop.permute.xlu1 %1080 }
 0x3de   : > { %v2458_v56 = vpop.eup %2457 }
 0x3df   : > { %v1057_v57 = vsel %vm729_vm2, %v2458_v56, 0.0 }
 0x3e0   : > { %1058 = vadd.xlane.f32.xlu0 %v1057_v57 }
 0x3e2   : > { %v2460_v58 = vpop.eup %2459 }
 0x3e3   : > { %v1060_v59 = vsel %vm729_vm2, %v2460_v58, 0.0 }
 0x3e4   : > { %1061 = vadd.xlane.f32.xlu1 %v1060_v59 }
 0x3e6   : > { %v2462_v60 = vpop.eup %2461 }
 0x3e7   : > { %v1063_v61 = vsel %vm729_vm2, %v2462_v60, 0.0 }
 0x3e8   : > { %1064 = vadd.xlane.f32.xlu0 %v1063_v61 }
 0x415   : > { %1086 = vxpose.xlu0.b32.start.end [1/1] (short) (narrow) %v1075_v62, 8 }
 0x417   : > { %1118 = vxpose.xlu1.b32.start.end [1/1] (short) (narrow) %v1077_v63, 8 }
 0x419   : > { %1150 = vxpose.xlu0.b32.start.end [1/1] (short) (narrow) %v1079_v1, 8 }
 0x41d   : > { %1182 = vxpose.xlu0.b32.start.end [1/1] (short) (narrow) %v1081_v2, 8  ;;  %v1799_v2 = vld [vmem:[%s3044_s4] sm:$0xff] }
 0x423   : > { %v1056_v3 = vpop.xlane.xlu1 %1055 }
 0x424   : > { %2463 = vrcp.f32 %v1056_v3 }
 0x431   : > { %v2464_v4 = vpop.eup %2463 }
 0x432   : > { %v1070_v6 = vmul.f32 %v2464_v4, %v2456_v45 }
 0x434   : > { %2326 = vmatpush3.xpose.msk.msra.mxu1 %vm729_vm2, %v1070_v6 }
 0x435   : > { %2335 = vmatprep.subr.mxu1 %v2601_v0 }
 0x469   : > { %v1059_v7 = vpop.xlane.xlu0 %1058 }
 0x46a   : > { %2465 = vrcp.f32 %v1059_v7 }
 0x46d   : > { %v1062_v10 = vpop.xlane.xlu1 %1061 }
 0x46e   : > { %2467 = vrcp.f32 %v1062_v10 }
 0x471   : > { %v1065_v11 = vpop.xlane.xlu0 %1064 }
 0x472   : > { %2469 = vrcp.f32 %v1065_v11 }
 0x477   : > { %v2466_v8 = vpop.eup %2465 }
 0x478   : > { %v1071_v9 = vmul.f32 %v2466_v8, %v2458_v56  ;;  %v1800_v56 = vld [vmem:[%s3044_s4 + $0x8] sm:$0xff] }
 0x47a   : > { %2331 = vmatpush3.xpose.msk.msra.mxu0 %vm729_vm2, %v1071_v9 }
 0x47b   : > { %2340 = vmatprep.subr.mxu0 %v2601_v0  ;;  %v2468_v12 = vpop.eup %2467 }
 0x47c   : > { %v1072_v15 = vmul.f32 %v2468_v12, %v2460_v58 }
 0x47f   : > { %v2470_v13 = vpop.eup %2469 }
 0x480   : > { %v1073_v17 = vmul.f32 %v2470_v13, %v2462_v60 }
 0x491   : > { %v1102_v14 = vpop.trf.xlu0 }
 0x492   : > { %2328 = vmatmul.mubr.msk.f32.vlgmr.msra.gmra.mxu1 %vm729_vm2, %v1102_v14 }
 0x493   : > { %2336 = vmatpush3.xpose.msk.msra.mxu1 %vm729_vm2, %v1072_v15  ;;  %v1134_v16 = vpop.trf.xlu1  ;;  %2337 = vmatprep.mubr.msk.f32.mxu1 %vm2602_vm0, %v2601_v0 }
 0x494   : > { %2333 = vmatmul.mubr.msk.f32.vlgmr.msra.gmra.mxu0 %vm729_vm2, %v1134_v16  ;;  %2367 = vmatprep.subr.mxu1 %v2601_v0 }
 0x495   : > { %2341 = vmatpush3.xpose.msk.msra.mxu0 %vm729_vm2, %v1073_v17  ;;  %v1166_v18 = vpop.trf.xlu0  ;;  %2342 = vmatprep.mubr.msk.f32.mxu0 %vm2602_vm0, %v2601_v0 }
 0x496   : > { %2338 = vmatmul.mubr.msk.f32.vlgmr.msra.gmra.mxu1 %vm729_vm2, %v1166_v18  ;;  %2345 = vmatprep.subr.mxu0 %v2601_v0 }
 0x497   : > { %2383 = vmatprep.mubr.msk.f32.mxu1 %vm2602_vm0, %v2601_v0 }
 0x499   : > { %v1198_v19 = vpop.trf.xlu0 }
 0x49a   : > { %2343 = vmatmul.mubr.msk.f32.vlgmr.msra.gmra.mxu0 %vm729_vm2, %v1198_v19 }
 0x49b   : > { %2353 = vmatprep.mubr.msk.f32.mxu0 %vm2602_vm0, %v2601_v0  ;;  %2346 = vmatpush3.msra.mxu0 %v1802_v28 }
 0x49c   : > { %2347 = vmatprep.subr.mxu0 %v2601_v0 }
 0x49d   : > { %2348 = vmatpush3.msra.mxu0 %v1801_v55  ;;  %v2002_v55 = vld [vmem:[%s3050_s10 + $0x10] sm:$0xff] }
 0x49e   : > { %2349 = vmatprep.subr.mxu0 %v2601_v0 }
 0x49f   : > { %2350 = vmatpush3.msra.mxu0 %v1800_v56  ;;  %v2001_v56 = vld [vmem:[%s3050_s10 + $0x8] sm:$0xff] }
 0x4a0   : > { %2351 = vmatprep.subr.mxu0 %v2601_v0 }
 0x4a1   : > { %2352 = vmatpush3.msra.mxu0 %v1799_v2 }
 0x4a2   : > { %2356 = vmatprep.subr.mxu0 %v2601_v0 }
 0x552   : > { %v1286_v20 = vpop.f32.mrf.mxu1 }
 0x553   : > { %1518 = vxpose.xlu1.b32.start.end [1/1] (short) (narrow) %v1286_v20, 8 }
 0x554   : > { %v2329_v21 = vpop.f32.mrf.mxu1  ;;  %v1362_v22 = vpop.f32.mrf.mxu0 }
 0x555   : > { %1550 = vxpose.xlu0.b32.start.end [1/1] (short) (narrow) %v1362_v22, 8 }
 0x556   : > { %v1438_v23 = vpop.f32.mrf.mxu1  ;;  %v2334_v24 = vpop.f32.mrf.mxu0 }
 0x557   : > { %1582 = vxpose.xlu1.b32.start.end [1/1] (short) (narrow) %v1438_v23, 8 }
 0x558   : > { %v2339_v25 = vpop.f32.mrf.mxu1 }
 0x55a   : > { %v1514_v26 = vpop.f32.mrf.mxu0 }
 0x55b   : > { %1614 = vxpose.xlu0.b32.start.end [1/1] (short) (narrow) %v1514_v26, 8  ;;  %v2240_v26 = vld [vmem:[%s3045_s5] ss:$0 sm:$0xff] }
 0x55c   : > { %v2344_v27 = vpop.f32.mrf.mxu0 }
 0x5cf   : > { %v1534_v32 = vpop.trf.xlu1 }
 0x5d1   : > { %v1566_v33 = vpop.trf.xlu0 }
 0x5d3   : > { %v1598_v38 = vpop.trf.xlu1 }
 0x5d4   : > { %v1646_v41 = vcombine.low %v1534_v32, %v1598_v38  ;;  %v1647_v42 = vcombine.high %v1534_v32, %v1598_v38  ;;  %v1918_v38 = vld [vmem:[%s3048_s8 + $0x18] sm:$0xff] }
 0x5d6   : > { %v1654_v47 = vrot.slane %v1646_v41, %v1653_v40  ;;  %v1661_v48 = vrot.slane %v1647_v42, %v1653_v40  ;;  %v2007_v41 = vld [vmem:[%s3050_s10 + $0x38] sm:$0xff]  ;;  %v2006_v42 = vld [vmem:[%s3050_s10 + $0x30] sm:$0xff] }
 0x5d7   : > { %v1630_v43 = vpop.trf.xlu0  ;;  %2368 = vmatpush3.msra.mxu1 %v2007_v41 }
 0x5d8   : > { %v1662_v44 = vcombine.low %v1566_v33, %v1630_v43  ;;  %v1663_v45 = vcombine.high %v1566_v33, %v1630_v43  ;;  %2369 = vmatprep.subr.mxu1 %v2601_v0  ;;  %v2005_v43 = vld [vmem:[%s3050_s10 + $0x28] sm:$0xff] }
 0x5d9   : > { %2370 = vmatpush3.msra.mxu1 %v2006_v42 }
 0x5da   : > { %v1670_v49 = vrot.slane %v1662_v44, %v1653_v40  ;;  %v1677_v50 = vrot.slane %v1663_v45, %v1653_v40  ;;  %2371 = vmatprep.subr.mxu1 %v2601_v0  ;;  %v2004_v44 = vld [vmem:[%s3050_s10 + $0x20] sm:$0xff]  ;;  %v2003_v45 = vld [vmem:[%s3050_s10 + $0x18] sm:$0xff] }
 0x5db   : > { %2372 = vmatpush3.msra.mxu1 %v2005_v43 }
 0x5dc   : > { %v1678_v51 = vcombine.low %v1654_v47, %v1670_v49  ;;  %v1679_v52 = vcombine.high %v1654_v47, %v1670_v49  ;;  %v1694_v53 = vcombine.low %v1661_v48, %v1677_v50  ;;  %v1695_v54 = vcombine.high %v1661_v48, %v1677_v50  ;;  %2373 = vmatprep.subr.mxu1 %v2601_v0  ;;  %v2242_v50 = vld [vmem:[%s3046_s6] ss:$0 sm:$0xff] }
 0x5dd   : > { %2374 = vmatpush3.msra.mxu1 %v2004_v44 }
 0x5de   : > { %v1686_v57 = vrot.slane %v1678_v51, %v1685_v46  ;;  %v1693_v58 = vrot.slane %v1679_v52, %v1685_v46  ;;  %v1702_v59 = vrot.slane %v1694_v53, %v1685_v46  ;;  %v1709_v60 = vrot.slane %v1695_v54, %v1685_v46  ;;  %2375 = vmatprep.subr.mxu1 %v2601_v0  ;;  %v2243_v52 = vld [vmem:[%s3047_s7] ss:$0 sm:$0xff] }
 0x5df   : > { %2376 = vmatpush3.msra.mxu1 %v2003_v45 }
 0x5e0   : > { %v1714_v61 = vcombine.low %v1686_v57, %v1693_v58  ;;  %v2238_v62 = vcombine.high %v1686_v57, %v1693_v58  ;;  %v1730_v63 = vcombine.low %v1702_v59, %v1709_v60  ;;  %v2239_v1 = vcombine.high %v1702_v59, %v1709_v60  ;;  %2377 = vmatprep.subr.mxu1 %v2601_v0  ;;  %v2000_v57 = vld [vmem:[%s3050_s10] sm:$0xff] }
 0x5e1   : > { %2378 = vmatpush3.msra.mxu1 %v2002_v55  ;;  %v2244_v58 = vld [vmem:[%s3049_s9] ss:$0 sm:$0xff] }
 0x5e2   : > { %v1721_v3 = vrot.slane %v1714_v61, %v1653_v40  ;;  %v1729_v4 = vrot.slane %v2238_v62, %v1653_v40  ;;  %v1737_v6 = vrot.slane %v1730_v63, %v1653_v40  ;;  %v1745_v7 = vrot.slane %v2239_v1, %v1653_v40  ;;  %v1915_v40 = vld [vmem:[%s3048_s8] sm:$0xff]  ;;  %2379 = vmatprep.subr.mxu1 %v2601_v0 }
 0x5e3   : > { %2380 = vmatpush3.msra.mxu1 %v2001_v56  ;;  %v2246_v63 = vld [vmem:[%s3051_s11] ss:$0 sm:$0xff] }
 0x5e4   : > { %v1747_v8 = vcombine.high %v1721_v3, %v1729_v4  ;;  %v1763_v9 = vcombine.high %v1737_v6, %v1745_v7  ;;  %v1746_v10 = vcombine.low %v1721_v3, %v1729_v4  ;;  %v1762_v11 = vcombine.low %v1737_v6, %v1745_v7  ;;  %2381 = vmatprep.subr.mxu1 %v2601_v0 }
 0x5e5   : > { %2382 = vmatpush3.msra.mxu1 %v2000_v57 }
 0x5e6   : > { %v1761_v12 = vrot.slane %v1747_v8, %v1685_v46  ;;  %v1777_v13 = vrot.slane %v1763_v9, %v1685_v46  ;;  %v1754_v14 = vrot.slane %v1746_v10, %v1685_v46  ;;  %v1770_v15 = vrot.slane %v1762_v11, %v1685_v46 }
 0x5e8   : > { %v1780_v16 = vcombine.low %v1761_v12, %v1777_v13  ;;  %v1779_v17 = vcombine.high %v1754_v14, %v1770_v15  ;;  %v1778_v18 = vcombine.low %v1754_v14, %v1770_v15  ;;  %v1781_v19 = vcombine.high %v1761_v12, %v1777_v13  ;;  %v2248_v15 = vld [vmem:[%s3052_s12] ss:$0 sm:$0xff] }
 0x5ea   : > { %1787 = vrot.lane.b32.xlu0 %v1780_v16, %s2610_s26  ;;  %1783 = vrot.lane.b32.xlu1 %v1779_v17, %s2611_s27  ;;  %v2249_v17 = vld [vmem:[%s3088_s24] ss:$0 sm:$0xff]  ;;  %s2251_s26 = sshll.u32 %s2710_s17, 7  ;;  %s495_s27 = scalar_lea.vmem [#allocation7], %s2221_s16 }
 0x5eb   : > { %s2132_s19 = scalar_lea.hbm %s3089_s1, %s2251_s26  ;;  %s2533_s17 = sshll.u32 %s2613_s23, 4  ;;  %s2534_s17 = int_to_ptr.vmem [resolvable:$false] %s2533_s17 }
 0x5ec   : > { %s2535_s16 = scalar_lea.vmem %s2534_s17, 256 }
 0x5ee   : > { %1791 = vrot.lane.b32.xlu1 %v1781_v19, %s2612_s22  ;;  %s2134_s22 = sshll.u32 %s495_s27, 4  ;;  %s2135_s22 = int_to_ptr.vmem [resolvable:$true] %s2134_s22 }
 0x5ef   : > { %s2529_s18 = scalar_lea.vmem %s2135_s22, 128  ;;  %p2536_p1 = scmp.lt.s32.totalorder %s2135_s22, %s2534_s17 }
 0x5f0   : > { %p2530_p9 = scmp.ne.s32.totalorder %s2135_s22, %s2529_s18  ;;  %p2537_p2 = scmp.lt.s32.totalorder %s2535_s16, %s2529_s18 }
 0x5f2   : > { %p2531_p13 = pnand %p2530_p9, %p3090_p11  ;;  %p2538_p0 = por %p2537_p2, %p2536_p1 }
 0x5f4   : > { %p2532_p10 = pneg %p2531_p13 }
 0x5f6   : > { %p2539_p3 = pnand %p2538_p0, %p2532_p10 }
 0x65c   : > { %v1784_v20 = vpop.permute.xlu1 %1783  ;;  %v1788_v21 = vpop.permute.xlu0 %1787 }
 0x65d   : > { %v1794_v22 = vsel %vm729_vm2, %v1778_v18, %v1784_v20 }
 0x65e   : > { %v1796_v24 = vsel %vm1795_vm4, %v1794_v22, %v1788_v21 }
 0x660   : > { %v1792_v23 = vpop.permute.xlu1 %1791 }
 0x661   : > { %v1798_v25 = vsel %vm1797_vm5, %v1796_v24, %v1792_v23 }
 0x662   : > { %2354 = vmatmul.mubr.msk.f32.vlgmr.msra.gmra.mxu0 %vm508_vm1, %v1798_v25 }
 0x663   : > { %2364 = vmatprep.mubr.msk.f32.mxu0 %vm2602_vm0, %v2601_v0  ;;  %2357 = vmatpush3.msra.mxu0 %v1918_v38 }
 0x664   : > { %2358 = vmatprep.subr.mxu0 %v2601_v0 }
 0x665   : > { %2359 = vmatpush3.msra.mxu0 %v1917_v39 }
 0x666   : > { %2360 = vmatprep.subr.mxu0 %v2601_v0 }
 0x722   : > { %v1879_v27 = vpop.f32.mrf.mxu0 }
 0x723   : > { %v1880_v28 = vadd.f32 %v2240_v26, %v1879_v27 }
 0x724   : > { %v2355_v29 = vpop.f32.mrf.mxu0 }
 0x725   : > { %v1883_v30 = vmax.f32 %v1880_v28, 0.0 }
 0x727   : > { %v1884_v31 = vadd.f32 %v1883_v30, %v2842_v5  ;;  %v1916_v5 = vld [vmem:[%s3048_s8 + $0x8] sm:$0xff] }
 0x728   : > { %2361 = vmatpush3.msra.mxu0 %v1916_v5 }
 0x729   : > { %v1887_v32 = vsel %vm508_vm1, %v1884_v31, 0.0  ;;  %2362 = vmatprep.subr.mxu0 %v2601_v0 }
 0x72a   : > { %1888 = vadd.xlane.f32.xlu1 %v1887_v32  ;;  %2363 = vmatpush3.msra.mxu0 %v1915_v40 }
 0x7b3   : > { %v1889_v33 = vpop.xlane.xlu1 %1888 }
 0x7b4   : > { %v1891_v34 = vmul.f32 0.03125, %v1889_v33 }
 0x7b6   : > { %v1892_v35 = vsub.f32 %v1884_v31, %v1891_v34 }
 0x7b8   : > { %v1893_v36 = vmul.f32 %v1892_v35, %v1892_v35 }
 0x7ba   : > { %v1894_v37 = vsel %vm508_vm1, %v1893_v36, 0.0 }
 0x7bb   : > { %1895 = vadd.xlane.f32.xlu0 %v1894_v37 }
 0x844   : > { %v1896_v46 = vpop.xlane.xlu0 %1895 }
 0x845   : > { %v1897_v47 = vmul.f32 0.03125, %v1896_v46 }
 0x847   : > { %v1898_v48 = vadd.f32 1e-05, %v1897_v47 }
 0x849   : > { %2471 = vrsqrt.f32 %v1898_v48 }
 0x856   : > { %v2472_v49 = vpop.eup %2471 }
 0x857   : > { %v1900_v51 = vmul.f32 %v2472_v49, %v1892_v35 }
 0x859   : > { %v1907_v53 = vmul.f32 %v2242_v50, %v1900_v51 }
 0x85b   : > { %v1914_v54 = vadd.f32 %v2243_v52, %v1907_v53 }
 0x85d   : > { %2365 = vmatmul.mubr.msk.f32.vlgmr.msra.gmra.mxu0 %vm508_vm1, %v1914_v54 }
 0x91d   : > { %v1995_v59 = vpop.f32.mrf.mxu0 }
 0x91e   : > { %v1996_v60 = vadd.f32 %v2244_v58, %v1995_v59 }
 0x91f   : > { %v2366_v61 = vpop.f32.mrf.mxu0 }
 0x920   : > { %v1999_v62 = vmax.f32 %v1996_v60, 0.0 }
 0x922   : > { %2384 = vmatmul.mubr.msk.f32.vlgmr.msra.gmra.mxu1 %vm2015_vm6, %v1999_v62 }
 0x9e2   : > { %v2085_v1 = vpop.f32.mrf.mxu1 }
 0x9e3   : > { %v2086_v2 = vadd.f32 %v2246_v63, %v2085_v1 }
 0x9e4   : > { %v2385_v3 = vpop.f32.mrf.mxu1 }
 0x9e5   : > { %v2089_v4 = vadd.f32 %v2086_v2, %v1914_v54 }
 0x9e7   : > { %v2092_v0 = vsel %vm508_vm1, %v2089_v4, 0.0 }
 0x9e8   : > { %2093 = vadd.xlane.f32.xlu1 %v2092_v0 }
 0xa71   : > { %v2094_v6 = vpop.xlane.xlu1 %2093 }
 0xa72   : > { %v2095_v7 = vmul.f32 0.03125, %v2094_v6 }
 0xa74   : > { %v2096_v8 = vsub.f32 %v2089_v4, %v2095_v7 }
 0xa76   : > { %v2097_v9 = vmul.f32 %v2096_v8, %v2096_v8 }
 0xa78   : > { %v2098_v10 = vsel %vm508_vm1, %v2097_v9, 0.0 }
 0xa79   : > { %2099 = vadd.xlane.f32.xlu0 %v2098_v10 }
 0xb02   : > { %v2100_v11 = vpop.xlane.xlu0 %2099 }
 0xb03   : > { %v2101_v12 = vmul.f32 0.03125, %v2100_v11 }
 0xb05   : > { %v2102_v13 = vadd.f32 1e-05, %v2101_v12 }
 0xb07   : > { %2473 = vrsqrt.f32 %v2102_v13 }
 0xb14   : > { %v2474_v14 = vpop.eup %2473 }
 0xb15   : > { %v2104_v16 = vmul.f32 %v2474_v14, %v2096_v8 }
 0xb17   : > { %v2111_v18 = vmul.f32 %v2248_v15, %v2104_v16 }
 0xb19   : > { %v2118_v19 = vadd.f32 %v2249_v17, %v2111_v18 }
 0xb1b   : > { %2119 = vst.msk [vmem:[%s495_s27] sm:$0xff] %vm508_vm1, %v2118_v19 }
 0xb1c   : > { %2542 = shalt.err (!%p2539_p3)
}
 0xb1d   : > { %s2543_s28 = scalar_lea.hbm %s2132_s19, 128  ;;  %s2547_s20 = scalar_lea.hbm %s3089_s1, 256 }
 0xb1e   : > { %p2544_p12 = scmp.ne.s32.totalorder %s2132_s19, %s2543_s28  ;;  %p2548_p4 = scmp.lt.s32.totalorder %s2132_s19, %s3089_s1 }
 0xb1f   : > { %p2549_p6 = scmp.lt.s32.totalorder %s2547_s20, %s2543_s28 }
 0xb20   : > { %p2545_p5 = pnand %p2544_p12, %p3090_p11 }
 0xb21   : > { %p2550_p8 = por %p2549_p6, %p2548_p4 }
 0xb22   : > { %p2546_p7 = pneg %p2545_p5 }
 0xb24   : > { %p2551_p9 = pnand %p2550_p8, %p2546_p7 }
 0xb26   : > { %2554 = shalt.err (!%p2551_p9)
}
 0xb27   : > { %2392 = dma.vmem_to_hbm [thread:$0]  (%p3090_p11), %s2135_s22, 128, %s2132_s19, %s2121_s21  }
 0xb28 PF: > { %s3091_s27 = sld [smem:[#allocation11_spill]] }
 0xb29   : > { %s3092_s14 = sld [smem:[#allocation14_spill]] }
 0xb2a   : > { %s3093_s13 = sld [smem:[#allocation13_spill]] }
 0xb2e   : > { %s2146_s18 = sand.u32 1, %s3091_s27  }
 0xb2f   : > { %p3094_p13 = scmp.ne.s32.totalorder %s3092_s14, 0  ;;  %s2147_s23 = scalar_lea.sflag [#allocation4], %s2146_s18 }
 0xb30   : > { %p3095_p10 = scmp.ge.s32.totalorder %s3093_s13, 2 }
 0xb32   : > { %p2403_p1 = pnand %p3095_p10, %p3094_p13 }
 0xb34   : > { %p2404_p2 = pneg %p2403_p1 }
 0xb36   : > { %2580 = dma.done.wait (%p2404_p2), %s2147_s23, 128  }
 0xb37   : > { %2582 = vsyncadd (%p2404_p2), %s2147_s23, 4294967168  ;;  %s3096_s16 = sld [smem:[#allocation15_spill]]  ;;  %s3099_s29 = smov %s2589_s30 }
 0xb38   : > { %s3097_s17 = sld [smem:[#allocation12_spill]] }
 0xb39   : > { %s3098_s15 = sld [smem:[#allocation16_spill]] }
 0xb3d   : > { %p28_p0 = scmp.ge.s32.totalorder %s3096_s16, 4  }
 0xb3e   : > { %s3100_s30 = smov %s3097_s17 }
 0xb3f   :  { %30 = sbr.rel (!%p28_p0) target bundleno = 10 (0xa), region = 125 }
 0xb44   :  { %2152 = vsyncpa [#allocation3], 1 }
 0xb45   :  { %2154 = vsyncpa [#allocation3 + $0x1], 1 }
 0xb46   :  { %2155 = vsyncpa [#allocation6], 1 }
 0xb47   :  { %2156 = vsyncpa [#allocation4], 1 }
 0xb48   :  { %2158 = vsyncpa [#allocation4 + $0x1], 1 }

</bundles_post_ra>
